<compile_context>
chip_gen: v7x
topology: tpu7x:2x2x1
jax: 0.10.0
libtpu: 0.0.40
codegen_flags: <defaults>
</compile_context>

<pallas_src>
import jax
import jax.numpy as jnp
from jax.experimental import pallas as pl
from jax.experimental.pallas import tpu as pltpu

HIDDEN = 128


def actor_kernel(x_ref, w1_ref, b1_ref, w2_ref, b2_ref, w3_ref, b3_ref, o_ref):
    # Matmul operands in bf16 (weights are pre-cast in the wrapper), accumulate f32.
    x = x_ref[...].astype(jnp.bfloat16)

    # l1 + ReLU
    h1 = jnp.dot(x, w1_ref[...], preferred_element_type=jnp.float32) + b1_ref[...]
    h1 = jnp.maximum(h1, 0.0).astype(jnp.bfloat16)

    # l2 + ReLU
    h2 = jnp.dot(h1, w2_ref[...], preferred_element_type=jnp.float32) + b2_ref[...]
    h2 = jnp.maximum(h2, 0.0).astype(jnp.bfloat16)

    # l3 -> [TB, action_dim]  (true output width; no lane padding)
    h3 = jnp.dot(h2, w3_ref[...], preferred_element_type=jnp.float32) + b3_ref[...]

    # LayerNorm(normalized_shape=action_dim, eps=0, elementwise_affine=False).
    # Biased variance, eps=0 exactly like the reference (NaN if a row is constant).
    mean = jnp.mean(h3, axis=-1, keepdims=True)
    centered = h3 - mean
    var = jnp.mean(centered * centered, axis=-1, keepdims=True)
    y = centered * jax.lax.rsqrt(var)

    # tanh, then map to [0, 1]
    o_ref[...] = jnp.tanh(y) * 0.5 + 0.5


def _pick_tile(B):
    """Choose the batch tile TB (rows per grid step)."""
    if B <= 512:
        return B  # single shot: no padding, no slicing, minimal launch overhead
    # Prefer the largest 8-aligned divisor of B that keeps >= 2 grid steps
    # (so both v7x TensorCores get work) and is <= 1024 (pipelining sweet spot).
    cap = min(1024, max(256, (B // 2) // 8 * 8))
    for t in range(cap, 127, -8):
        if B % t == 0:
            return t
    # No clean divisor: single shot if it still fits comfortably, else pad fallback.
    # TODO(synk): ragged tail could be handled with a masked last tile instead of jnp.pad.
    return B if B <= 1024 else cap


def actor_forward(x, params, *, matmul_dtype=jnp.bfloat16):
    w1, b1, w2, b2, w3, b3 = params
    B, state_dim = x.shape
    action_dim = w3.shape[1]

    # Pre-cast weights once (tiny, ~78 KiB total); biases stay f32.
    w1c = w1.astype(matmul_dtype)
    w2c = w2.astype(matmul_dtype)
    w3c = w3.astype(matmul_dtype)

    TB = _pick_tile(B)
    B_pad = pl.cdiv(B, TB) * TB
    x_in = x if B_pad == B else jnp.pad(x, ((0, B_pad - B), (0, 0)))
    grid = (B_pad // TB,)

    def const_spec(shape):
        # Constant index map -> weights/biases stay VMEM-resident across grid steps.
        return pl.BlockSpec(shape, lambda i: (0, 0))

    wbytes = (w1c.size + w2c.size + w3c.size) * 2 + (b1.size + b2.size + b3.size) * 4
    cost = pl.CostEstimate(
        flops=2 * B_pad * (state_dim * HIDDEN + HIDDEN * HIDDEN + HIDDEN * action_dim),
        transcendentals=B_pad * (action_dim + 1),  # tanh per element + rsqrt per row
        bytes_accessed=B_pad * state_dim * 4 + B_pad * action_dim * 4 + wbytes,
    )

    out = pl.pallas_call(
        actor_kernel,
        out_shape=jax.ShapeDtypeStruct((B_pad, action_dim), jnp.float32),
        grid=grid,
        in_specs=[
            pl.BlockSpec((TB, state_dim), lambda i: (i, 0)),
            const_spec(w1c.shape), const_spec(b1.shape),
            const_spec(w2c.shape), const_spec(b2.shape),
            const_spec(w3c.shape), const_spec(b3.shape),
        ],
        out_specs=pl.BlockSpec((TB, action_dim), lambda i: (i, 0)),
        compiler_params=pltpu.CompilerParams(
            dimension_semantics=("parallel",)),
        cost_estimate=cost,
    )(x_in, w1c, b1, w2c, b2, w3c, b3)

    return out if B_pad == B else out[:B]


def actor_ref(x, params):
    """Pure-JAX f32 reference of the PyTorch forward."""
    w1, b1, w2, b2, w3, b3 = params
    h1 = jnp.maximum(x @ w1 + b1, 0.0)
    h2 = jnp.maximum(h1 @ w2 + b2, 0.0)
    h3 = h2 @ w3 + b3
    mean = jnp.mean(h3, axis=-1, keepdims=True)
    c = h3 - mean
    var = jnp.mean(c * c, axis=-1, keepdims=True)
    y = jnp.tanh(c * jax.lax.rsqrt(var))
    return (y + 1.0) / 2.0


def init_params(key, state_dim, action_dim, hidden=HIDDEN):
    """Deterministic init mirroring nn.Linear default: U(-1/sqrt(in), 1/sqrt(in))."""
    def linear(k, fan_in, fan_out):
        kw, kb = jax.random.split(k)
        bound = 1.0 / jnp.sqrt(fan_in)
        w = jax.random.uniform(kw, (fan_in, fan_out), jnp.float32, -bound, bound)
        b = jax.random.uniform(kb, (1, fan_out), jnp.float32, -bound, bound)
        return w, b

    k1, k2, k3 = jax.random.split(key, 3)
    w1, b1 = linear(k1, state_dim, hidden)
    w2, b2 = linear(k2, hidden, hidden)
    w3, b3 = linear(k3, hidden, action_dim)
    return w1, b1, w2, b2, w3, b3


if __name__ == "__main__":
    key = jax.random.PRNGKey(0)
    kx, kp = jax.random.split(key)

    batch = 2
    state_dim = 16
    action_dim = 8

    x = jax.random.normal(kx, (batch, state_dim), jnp.float32)
    params = init_params(kp, state_dim, action_dim)

    out = actor_forward(x, params)
    jax.block_until_ready(out)

    ref = actor_ref(x, params)

    assert out.shape == (batch, action_dim)
    assert bool(jnp.all(jnp.isfinite(out)))
    assert bool(jnp.all(out >= 0.0)) and bool(jnp.all(out <= 1.0))
    # bf16 matmul operands with f32 accumulation vs. f32 reference -> slightly
    # looser tolerance than the pure-f32 version.
    assert bool(jnp.allclose(out, ref, atol=2e-2, rtol=2e-2))

    print("KERNEL_OK")
</pallas_src>

<mosaic_0001>
module attributes {stable_mosaic.version = 11 : i64} {
  func.func @actor_kernel(%arg0: i32, %arg1: memref<2x16xf32, #tpu.memory_space<vmem>>, %arg2: memref<16x128xbf16, #tpu.memory_space<vmem>>, %arg3: memref<1x128xf32, #tpu.memory_space<vmem>>, %arg4: memref<128x128xbf16, #tpu.memory_space<vmem>>, %arg5: memref<1x128xf32, #tpu.memory_space<vmem>>, %arg6: memref<128x8xbf16, #tpu.memory_space<vmem>>, %arg7: memref<1x8xf32, #tpu.memory_space<vmem>>, %arg8: memref<2x8xf32, #tpu.memory_space<vmem>>) attributes {dimension_semantics = [#tpu.dimension_semantics<parallel>], iteration_bounds = array<i64: 1>, scalar_prefetch = 0 : i64, scratch_operands = 0 : i64, tpu.core_type = #tpu.core_type<tc>, window_params = [{transform_indices = @transform_0, window_bounds = array<i64: 2, 16>}, {pipeline_mode = #tpu.pipeline_mode<synchronous>, transform_indices = @transform_1, window_bounds = array<i64: 16, 128>}, {pipeline_mode = #tpu.pipeline_mode<synchronous>, transform_indices = @transform_2, window_bounds = array<i64: 1, 128>}, {pipeline_mode = #tpu.pipeline_mode<synchronous>, transform_indices = @transform_3, window_bounds = array<i64: 128, 128>}, {pipeline_mode = #tpu.pipeline_mode<synchronous>, transform_indices = @transform_4, window_bounds = array<i64: 1, 128>}, {pipeline_mode = #tpu.pipeline_mode<synchronous>, transform_indices = @transform_5, window_bounds = array<i64: 128, 8>}, {pipeline_mode = #tpu.pipeline_mode<synchronous>, transform_indices = @transform_6, window_bounds = array<i64: 1, 8>}, {transform_indices = @transform_7, window_bounds = array<i64: 2, 8>}]} {
    %c0 = arith.constant 0 : index
    %c0_0 = arith.constant 0 : index
    %0 = vector.load %arg1[%c0, %c0_0] : memref<2x16xf32, #tpu.memory_space<vmem>>, vector<2x16xf32>
    %1 = arith.truncf %0 : vector<2x16xf32> to vector<2x16xbf16>
    %c0_1 = arith.constant 0 : index
    %c0_2 = arith.constant 0 : index
    %2 = vector.load %arg2[%c0_1, %c0_2] : memref<16x128xbf16, #tpu.memory_space<vmem>>, vector<16x128xbf16>
    %cst = arith.constant dense<0.000000e+00> : vector<2x128xf32>
    %3 = tpu.matmul %1, %2, %cst {dimension_numbers = #tpu.dot_dimension_numbers<[1], [0], [0], [1], [0, 0, 1, 1], [], []>} : vector<2x16xbf16>, vector<16x128xbf16>, vector<2x128xf32> -> vector<2x128xf32>
    %c0_3 = arith.constant 0 : index
    %c0_4 = arith.constant 0 : index
    %4 = vector.load %arg3[%c0_3, %c0_4] : memref<1x128xf32, #tpu.memory_space<vmem>>, vector<1x128xf32>
    %5 = vector.broadcast %4 : vector<1x128xf32> to vector<2x128xf32>
    %6 = arith.addf %3, %5 : vector<2x128xf32>
    %cst_5 = arith.constant 0.000000e+00 : f32
    %7 = vector.broadcast %cst_5 : f32 to vector<2x128xf32>
    %8 = arith.maximumf %6, %7 : vector<2x128xf32>
    %9 = arith.truncf %8 : vector<2x128xf32> to vector<2x128xbf16>
    %c0_6 = arith.constant 0 : index
    %c0_7 = arith.constant 0 : index
    %10 = vector.load %arg4[%c0_6, %c0_7] : memref<128x128xbf16, #tpu.memory_space<vmem>>, vector<128x128xbf16>
    %cst_8 = arith.constant dense<0.000000e+00> : vector<2x128xf32>
    %11 = tpu.matmul %9, %10, %cst_8 {dimension_numbers = #tpu.dot_dimension_numbers<[1], [0], [0], [1], [0, 0, 1, 1], [], []>} : vector<2x128xbf16>, vector<128x128xbf16>, vector<2x128xf32> -> vector<2x128xf32>
    %c0_9 = arith.constant 0 : index
    %c0_10 = arith.constant 0 : index
    %12 = vector.load %arg5[%c0_9, %c0_10] : memref<1x128xf32, #tpu.memory_space<vmem>>, vector<1x128xf32>
    %13 = vector.broadcast %12 : vector<1x128xf32> to vector<2x128xf32>
    %14 = arith.addf %11, %13 : vector<2x128xf32>
    %cst_11 = arith.constant 0.000000e+00 : f32
    %15 = vector.broadcast %cst_11 : f32 to vector<2x128xf32>
    %16 = arith.maximumf %14, %15 : vector<2x128xf32>
    %17 = arith.truncf %16 : vector<2x128xf32> to vector<2x128xbf16>
    %c0_12 = arith.constant 0 : index
    %c0_13 = arith.constant 0 : index
    %18 = vector.load %arg6[%c0_12, %c0_13] : memref<128x8xbf16, #tpu.memory_space<vmem>>, vector<128x8xbf16>
    %cst_14 = arith.constant dense<0.000000e+00> : vector<2x8xf32>
    %19 = tpu.matmul %17, %18, %cst_14 {dimension_numbers = #tpu.dot_dimension_numbers<[1], [0], [0], [1], [0, 0, 1, 1], [], []>} : vector<2x128xbf16>, vector<128x8xbf16>, vector<2x8xf32> -> vector<2x8xf32>
    %c0_15 = arith.constant 0 : index
    %c0_16 = arith.constant 0 : index
    %20 = vector.load %arg7[%c0_15, %c0_16] : memref<1x8xf32, #tpu.memory_space<vmem>>, vector<1x8xf32>
    %21 = vector.broadcast %20 : vector<1x8xf32> to vector<2x8xf32>
    %22 = arith.addf %19, %21 : vector<2x8xf32>
    %cst_17 = arith.constant dense<0.000000e+00> : vector<2xf32>
    %23 = vector.multi_reduction <add>, %22, %cst_17 [1] : vector<2x8xf32> to vector<2xf32>
    %24 = vector.shape_cast %23 : vector<2xf32> to vector<2x1xf32>
    %cst_18 = arith.constant 8.000000e+00 : f32
    %25 = vector.broadcast %cst_18 : f32 to vector<2x1xf32>
    %26 = arith.divf %24, %25 : vector<2x1xf32>
    %27 = vector.broadcast %26 : vector<2x1xf32> to vector<2x8xf32>
    %28 = arith.subf %22, %27 : vector<2x8xf32>
    %29 = arith.mulf %28, %28 : vector<2x8xf32>
    %cst_19 = arith.constant dense<0.000000e+00> : vector<2xf32>
    %30 = vector.multi_reduction <add>, %29, %cst_19 [1] : vector<2x8xf32> to vector<2xf32>
    %31 = vector.shape_cast %30 : vector<2xf32> to vector<2x1xf32>
    %cst_20 = arith.constant 8.000000e+00 : f32
    %32 = vector.broadcast %cst_20 : f32 to vector<2x1xf32>
    %33 = arith.divf %31, %32 : vector<2x1xf32>
    %34 = math.rsqrt %33 : vector<2x1xf32>
    %35 = vector.broadcast %34 : vector<2x1xf32> to vector<2x8xf32>
    %36 = arith.mulf %28, %35 : vector<2x8xf32>
    %37 = math.tanh %36 : vector<2x8xf32>
    %cst_21 = arith.constant 5.000000e-01 : f32
    %38 = vector.broadcast %cst_21 : f32 to vector<2x8xf32>
    %39 = arith.mulf %37, %38 : vector<2x8xf32>
    %cst_22 = arith.constant 5.000000e-01 : f32
    %40 = vector.broadcast %cst_22 : f32 to vector<2x8xf32>
    %41 = arith.addf %39, %40 : vector<2x8xf32>
    %c0_23 = arith.constant 0 : index
    %c0_24 = arith.constant 0 : index
    %42 = vector.load %arg8[%c0_23, %c0_24] : memref<2x8xf32, #tpu.memory_space<vmem>>, vector<2x8xf32>
    tpu.vector_store %arg8[%c0_23, %c0_24], %41 {strides = array<i32>} : memref<2x8xf32, #tpu.memory_space<vmem>>, vector<2x8xf32>,
    return
  }
  func.func @transform_0(%arg0: i32) -> (i32, i32) {
    %c0_i32 = arith.constant 0 : i32
    %c0_i32_0 = arith.constant 0 : i32
    return %arg0, %c0_i32 : i32, i32
  }
  func.func @transform_1(%arg0: i32) -> (i32, i32) {
    %c0_i32 = arith.constant 0 : i32
    %c0_i32_0 = arith.constant 0 : i32
    %c0_i32_1 = arith.constant 0 : i32
    return %c0_i32, %c0_i32_0 : i32, i32
  }
  func.func @transform_2(%arg0: i32) -> (i32, i32) {
    %c0_i32 = arith.constant 0 : i32
    %c0_i32_0 = arith.constant 0 : i32
    %c0_i32_1 = arith.constant 0 : i32
    return %c0_i32, %c0_i32_0 : i32, i32
  }
  func.func @transform_3(%arg0: i32) -> (i32, i32) {
    %c0_i32 = arith.constant 0 : i32
    %c0_i32_0 = arith.constant 0 : i32
    %c0_i32_1 = arith.constant 0 : i32
    return %c0_i32, %c0_i32_0 : i32, i32
  }
  func.func @transform_4(%arg0: i32) -> (i32, i32) {
    %c0_i32 = arith.constant 0 : i32
    %c0_i32_0 = arith.constant 0 : i32
    %c0_i32_1 = arith.constant 0 : i32
    return %c0_i32, %c0_i32_0 : i32, i32
  }
  func.func @transform_5(%arg0: i32) -> (i32, i32) {
    %c0_i32 = arith.constant 0 : i32
    %c0_i32_0 = arith.constant 0 : i32
    %c0_i32_1 = arith.constant 0 : i32
    return %c0_i32, %c0_i32_0 : i32, i32
  }
  func.func @transform_6(%arg0: i32) -> (i32, i32) {
    %c0_i32 = arith.constant 0 : i32
    %c0_i32_0 = arith.constant 0 : i32
    %c0_i32_1 = arith.constant 0 : i32
    return %c0_i32, %c0_i32_0 : i32, i32
  }
  func.func @transform_7(%arg0: i32) -> (i32, i32) {
    %c0_i32 = arith.constant 0 : i32
    %c0_i32_0 = arith.constant 0 : i32
    return %arg0, %c0_i32 : i32, i32
  }
}

</mosaic_0001>

<bundles_post_ra>
// kernel: tpu_custom_call.1
= control target key start
LH: loop header
LB: loop body
LE: loop exit
PB: predicated region body
PF: predicated region fallthrough
CT: control target
= control target key end

     0   :  { %v482_v1 = vmov 0.0   ;;  %vm483_vm0 = vmmov 0   ;;  %vm45_vm1 = vcmask 130048   ;;  %s623_s0 = inlined_call_operand.vmem [shape: f32[2,16], index: 0, kind: input, shape index: {}]   ;;  %s624_s1 = inlined_call_operand.vmem [shape: bf16[16,128], index: 1, kind: input, shape index: {}]   ;;  %s625_s2 = inlined_call_operand.vmem [shape: f32[1,128], index: 2, kind: input, shape index: {}]   ;;  %s626_s3 = inlined_call_operand.vmem [shape: bf16[128,128], index: 3, kind: input, shape index: {}]   ;;  %s627_s4 = inlined_call_operand.vmem [shape: f32[1,128], index: 4, kind: input, shape index: {}]   ;;  %s628_s5 = inlined_call_operand.vmem [shape: bf16[128,8], index: 5, kind: input, shape index: {}]   ;;  %s629_s6 = inlined_call_operand.vmem [shape: f32[1,8], index: 6, kind: input, shape index: {}]   ;;  %s630_s7 = inlined_call_operand.hbm [shape: f32[2,8], index: 7, kind: output, shape index: {}]  }
   0x1   :  { %v437_v0 = vld [vmem:[%s624_s1] sm:$0xff]   ;;  %388 = vmatprep.subr.bf16.mxu0 %v482_v1  ;;  %394 = vmatprep.subr.bf16.mxu1 %v482_v1  ;;  %v439_v5 = vld [vmem:[%s626_s3 + $0x8] sm:$0xff]   ;;  %v440_v6 = vld [vmem:[%s626_s3 + $0x10] sm:$0xff]  }
   0x2   :  { %v28_v2 = vld [vmem:[%s623_s0] sm:$0x3]  ;;  %389 = vmatpush3.bf16.msra.mxu0 %v437_v0  ;;  %390 = vmatprep.mubr.msk.bf16.mxu0 %vm483_vm0, %v482_v1  ;;  %v441_v7 = vld [vmem:[%s626_s3 + $0x18] sm:$0xff]  }
   0x3   :  { %v29_v3 = vpack.c.bf16 %v28_v2, %v28_v2  ;;  %v438_v4 = vld [vmem:[%s626_s3] sm:$0xff]   ;;  %410 = vmatprep.mubr.msk.bf16.mxu1 %vm483_vm0, %v482_v1  ;;  %414 = vmatprep.subr.bf16.mxu0 %v482_v1 }
   0x4   :  { %395 = vmatpush3.bf16.msra.mxu1 %v438_v4 }
   0x5   :  { %391 = vmatmul.mubr.msk.bf16.vlgmr.msra.gmra.mrb[0].mxu0 %vm45_vm1, %v29_v3  ;;  %396 = vmatprep.subr.bf16.mxu1 %v482_v1 }
   0x6   :  { %430 = vmatprep.mubr.msk.bf16.mxu0 %vm483_vm0, %v482_v1 }
   0x8   :  { %397 = vmatpush3.bf16.msra.mxu1 %v439_v5 }
   0x9   :  { %398 = vmatprep.subr.bf16.mxu1 %v482_v1 }
   0xc   :  { %399 = vmatpush3.bf16.msra.mxu1 %v440_v6 }
   0xd   :  { %400 = vmatprep.subr.bf16.mxu1 %v482_v1 }
   0xe   :  { %12 = vsyncpa [#allocation3], 0  ;;  %v442_v8 = vld [vmem:[%s626_s3 + $0x20] sm:$0xff]   ;;  %v443_v9 = vld [vmem:[%s626_s3 + $0x28] sm:$0xff]   ;;  %vm315_vm2 = vcmask 58368  }
   0xf   :  { %v444_v10 = vld [vmem:[%s626_s3 + $0x30] sm:$0xff]   ;;  %v445_v11 = vld [vmem:[%s626_s3 + $0x38] sm:$0xff]   ;;  %v446_v12 = vld [vmem:[%s628_s5] sm:$0xff]  }
  0x10   :  { %401 = vmatpush3.bf16.msra.mxu1 %v441_v7  ;;  %415 = vmatpush3.bf16.msra.mxu0 %v446_v12  ;;  %v447_v13 = vld [vmem:[%s628_s5 + $0x8] sm:$0xff]   ;;  %v448_v14 = vld [vmem:[%s628_s5 + $0x10] sm:$0xff]   ;;  %v449_v15 = vld [vmem:[%s628_s5 + $0x18] sm:$0xff]  }
  0x11   :  { %402 = vmatprep.subr.bf16.mxu1 %v482_v1  ;;  %416 = vmatprep.subr.bf16.mxu0 %v482_v1  ;;  %v450_v16 = vld [vmem:[%s628_s5 + $0x20] sm:$0xff]   ;;  %v451_v17 = vld [vmem:[%s628_s5 + $0x28] sm:$0xff]   ;;  %v452_v26 = vld [vmem:[%s628_s5 + $0x30] sm:$0xff]  }
  0x12   :  { %v347_v18 = vld [vmem:[%s625_s2] ss:$0 sm:$0xff]  ;;  %v453_v27 = vld [vmem:[%s628_s5 + $0x38] sm:$0xff]  }
  0x13   :  { %v350_v28 = vld [vmem:[%s627_s4] ss:$0 sm:$0xff]  ;;  %s484_s4 = smov [#allocation2]  }
  0x14   :  { %403 = vmatpush3.bf16.msra.mxu1 %v442_v8  ;;  %417 = vmatpush3.bf16.msra.mxu0 %v447_v13  ;;  %v359_v36 = vld [vmem:[%s629_s6] ss:$0 sm:$0xff]  ;;  %s339_s5 = sshll.u32 %s484_s4, 4  ;;  %s340_s5 = int_to_ptr.vmem [resolvable:$true] %s339_s5 }
  0x15   :  { %404 = vmatprep.subr.bf16.mxu1 %v482_v1  ;;  %418 = vmatprep.subr.bf16.mxu0 %v482_v1  ;;  %s458_s6 = scalar_lea.vmem %s340_s5, 32  ;;  %p463_p1 = scmp.lt.s32.totalorder %s340_s5, %s340_s5 }
  0x16   :  { %p459_p0 = scmp.ne.s32.totalorder %s340_s5, %s458_s6  ;;  %p464_p2 = scmp.lt.s32.totalorder %s458_s6, %s458_s6 }
  0x18   :  { %405 = vmatpush3.bf16.msra.mxu1 %v443_v9  ;;  %419 = vmatpush3.bf16.msra.mxu0 %v448_v14  ;;  %p465_p3 = por %p464_p2, %p463_p1 }
  0x19   :  { %406 = vmatprep.subr.bf16.mxu1 %v482_v1  ;;  %420 = vmatprep.subr.bf16.mxu0 %v482_v1 }
  0x1a   :  { %p466_p4 = pnand %p465_p3, %p459_p0 }
  0x1c   :  { %407 = vmatpush3.bf16.msra.mxu1 %v444_v10  ;;  %421 = vmatpush3.bf16.msra.mxu0 %v449_v15 }
  0x1d   :  { %408 = vmatprep.subr.bf16.mxu1 %v482_v1  ;;  %422 = vmatprep.subr.bf16.mxu0 %v482_v1 }
  0x20   :  { %409 = vmatpush3.bf16.msra.mxu1 %v445_v11  ;;  %423 = vmatpush3.bf16.msra.mxu0 %v450_v16 }
  0x21   :  { %424 = vmatprep.subr.bf16.mxu0 %v482_v1 }
  0x24   :  { %425 = vmatpush3.bf16.msra.mxu0 %v451_v17 }
  0x25   :  { %426 = vmatprep.subr.bf16.mxu0 %v482_v1 }
  0x28   :  { %427 = vmatpush3.bf16.msra.mxu0 %v452_v26 }
  0x29   :  { %428 = vmatprep.subr.bf16.mxu0 %v482_v1 }
  0x2c   :  { %429 = vmatpush3.bf16.msra.mxu0 %v453_v27 }
  0xd8   :  { %v83_v19 = vpop.f32.mrb[0].mxu0 }
  0xd9   :  { %v84_v20 = vadd.f32 %v347_v18, %v83_v19  ;;  %v392_v21 = vpop.f32.mrb[1].mxu0 }
  0xda   :  { %v86_v22 = vpop.f32.mrb[2].mxu0 }
  0xdb   :  { %v89_v23 = vmax.f32 %v84_v20, 0.0  ;;  %v393_v24 = vpop.f32.mrb[3].mxu0 }
  0xdd   :  { %v90_v25 = vpack.c.bf16 %v89_v23, %v89_v23 }
  0xdf   :  { %411 = vmatmul.mubr.bf16.vlgmr.msra.gmra.mrb[0].mxu1 %v90_v25 }
 0x1b2   :  { %v196_v29 = vpop.f32.mrb[0].mxu1 }
 0x1b3   :  { %v197_v30 = vadd.f32 %v350_v28, %v196_v29  ;;  %v412_v31 = vpop.f32.mrb[1].mxu1 }
 0x1b4   :  { %v199_v32 = vpop.f32.mrb[2].mxu1 }
 0x1b5   :  { %v202_v33 = vmax.f32 %v197_v30, 0.0  ;;  %v413_v34 = vpop.f32.mrb[3].mxu1 }
 0x1b7   :  { %v203_v35 = vpack.c.bf16 %v202_v33, %v202_v33 }
 0x1b9   :  { %431 = vmatmul.mubr.bf16.vlgmr.msra.gmra.mrb[4].mxu0 %v203_v35 }
 0x28c   :  { %v309_v37 = vpop.f32.mrb[4].mxu0 }
 0x28d   :  { %v310_v38 = vadd.f32 %v359_v36, %v309_v37  ;;  %v432_v39 = vpop.f32.mrb[5].mxu0 }
 0x28e   :  { %v312_v40 = vpop.f32.mrb[6].mxu0 }
 0x28f   :  { %v433_v41 = vpop.f32.mrb[7].mxu0  ;;  %v316_v42 = vsel %vm315_vm2, %v310_v38, 0.0 }
 0x290   :  { %317 = vadd.xlane.f32.xlu0 %v316_v42 }
 0x31d   :  { %v318_v43 = vpop.xlane.xlu0 %317 }
 0x31e   :  { %v320_v44 = vmul.f32 0.125, %v318_v43 }
 0x320   :  { %v321_v45 = vsub.f32 %v310_v38, %v320_v44 }
 0x322   :  { %v322_v46 = vmul.f32 %v321_v45, %v321_v45 }
 0x324   :  { %v323_v47 = vsel %vm315_vm2, %v322_v46, 0.0 }
 0x325   :  { %324 = vadd.xlane.f32.xlu0 %v323_v47 }
 0x3b2   :  { %v325_v48 = vpop.xlane.xlu0 %324 }
 0x3b3   :  { %v326_v49 = vmul.f32 0.125, %v325_v48 }
 0x3b5   :  { %454 = vrsqrt.f32 %v326_v49 }
 0x3bf   :  { %v455_v50 = vpop.eup %454 }
 0x3c0   :  { %v328_v51 = vmul.f32 %v455_v50, %v321_v45 }
 0x3c2   :  { %456 = vtanh.f32 %v328_v51 }
 0x3cc   :  { %v457_v52 = vpop.eup %456 }
 0x3cd   :  { %v330_v53 = vmul.f32 0.5, %v457_v52 }
 0x3cf   :  { %v331_v54 = vadd.f32 0.5, %v330_v53 }
 0x3d1   :  { %332 = vst.msk [vmem:[#allocation2] sm:$0x3] %vm315_vm2, %v331_v54 }
 0x3d2   :  { %469 = shalt.err (!%p466_p4)
}
 0x3d3   :  { %s470_s16 = scalar_lea.hbm %s630_s7, 32 }
 0x3d4   :  { %p471_p5 = scmp.ne.s32.totalorder %s630_s7, %s470_s16  ;;  %p474_p6 = scmp.lt.u32.totalorder %s470_s16, %s630_s7 }
 0x3d6   :  { %p476_p7 = pnand %p474_p6, %p471_p5 }
 0x3d8   :  { %479 = shalt.err (!%p476_p7)
}
 0x3d9   :  { %342 = dma.vmem_to_hbm [thread:$0]  %s340_s5, 32, %s630_s7, [#allocation3]  }
 0x3da   :  { %480 = dma.done.wait [#allocation3], 32  }
 0x3db   :  { %481 = vsyncadd [#allocation3], 4294967264 }
 0x3dc   :  { %346 = vsyncpa [#allocation3], 1 }

</bundles_post_ra>
